<compile_context>
chip_gen: v7x
topology: tpu7x:2x2x1
jax: 0.10.0
libtpu: 0.0.40
codegen_flags: <defaults>
</compile_context>

<pallas_src>
import functools

import jax
import jax.numpy as jnp
from jax import lax
from jax.experimental import pallas as pl
from jax.experimental.pallas import tpu as pltpu

_LANE = 128
_GOLD = 0x9E3779B9          # seed mixing constant
_MIX1 = 0x7FEB352D          # lowbias32 constants
_MIX2 = 0x846CA68B


def _noise_add_kernel(seed_ref, sigma_ref, x_ref, o_ref, *, hw, r_tile, l_tile):
    # seed_ref : SMEM (1,) int32
    # sigma_ref: VMEM (R_tile, 1) float32   (per-row sigma, pre-scaled by 2^-24)
    # x_ref    : VMEM (R_tile, L_tile) x.dtype
    # o_ref    : VMEM (R_tile, L_tile) x.dtype
    #
    # Counter-based PRNG: hash(seed, global flat element index) -> uniform [0,1).
    # Pure lax/jnp integer ops -> works on Mosaic and in interpret mode, and the
    # noise is independent of the tiling (tiling-invariant determinism).
    base = pl.program_id(0) * (r_tile * hw) + pl.program_id(1) * l_tile

    rows = lax.broadcasted_iota(jnp.int32, (r_tile, l_tile), 0)
    cols = lax.broadcasted_iota(jnp.int32, (r_tile, l_tile), 1)
    idx = rows * hw + cols + base                       # global flat index

    seed_mixed = seed_ref[0].astype(jnp.uint32) * jnp.uint32(_GOLD)
    h = idx.astype(jnp.uint32) ^ seed_mixed
    h = h ^ lax.shift_right_logical(h, jnp.uint32(16))
    h = h * jnp.uint32(_MIX1)
    h = h ^ lax.shift_right_logical(h, jnp.uint32(15))
    h = h * jnp.uint32(_MIX2)
    h = h ^ lax.shift_right_logical(h, jnp.uint32(16))

    # Top 24 bits -> float in [0, 2^24); sigma_ref already carries the 2^-24
    # scale, so noise = sigma * uniform[0,1) with a single VPU multiply.
    bits24 = lax.shift_right_logical(h, jnp.uint32(8)).astype(jnp.int32)
    u = bits24.astype(jnp.float32)
    noise = sigma_ref[...] * u                          # (R,1) broadcast * (R,L)
    o_ref[...] = (x_ref[...].astype(jnp.float32) + noise).astype(o_ref.dtype)


def _round_up(a, b):
    return (a + b - 1) // b * b


def _per_tile_byte_cap():
    # v6e: 128 MiB physical / 32 MiB scoped default -> 4 MiB tiles are safe and
    # shave per-grid-step overhead.  v5e (16 MiB scoped default) and v7x
    # (64 MiB physical, 2 resident TCs) stay at 2 MiB.
    try:
        kind = jax.devices()[0].device_kind.lower()
    except Exception:
        return 2 << 20
    if "v6" in kind:
        return 4 << 20
    return 2 << 20


def _pick_lane_tile(hw):
    if hw < _LANE:
        return hw                                   # full-dim block (tiny spatial)
    # Prefer an exact 128-multiple divisor (no masked edge block at all).
    for cand in (2048, 1024, 512, 384, 256, 128):
        if cand <= hw and hw % cand == 0:
            return cand
    # Otherwise: 128-aligned tile + cdiv grid; only the edge block is masked.
    return min(2048, (hw // _LANE) * _LANE)


def gaussian_noise_channelwise(x, sigma, seed, *, in_place=False):
    """x: (N, C, H, W); sigma: (C,) per-channel std; seed: python int / int32."""
    N, C, H, W = x.shape
    R, HW = N * C, H * W

    x2 = x.reshape(R, HW)                               # row-major, free reshape
    sigma = jnp.asarray(sigma, dtype=jnp.float32).reshape(C)
    # Fold the 2^-24 uniform scale into sigma (saves VPU ops in the kernel).
    sigma_rows = jnp.broadcast_to(
        (sigma * jnp.float32(2.0 ** -24))[None, :], (N, C)).reshape(R, 1)
    seed_arr = jnp.asarray([seed], dtype=jnp.int32)

    itemsize = jnp.dtype(x.dtype).itemsize
    # dtype-aware sublane granularity: f32 -> 8, bf16 -> 16, int8/fp8 -> 32.
    sub = {4: 8, 2: 16, 1: 32}.get(itemsize, 8)

    L_tile = _pick_lane_tile(HW)
    cap = _per_tile_byte_cap()
    max_rows = max(sub, (cap // max(1, L_tile * itemsize)) // sub * sub)
    R_tile = min(max_rows, _round_up(R, sub))

    # Make sure a v7x chip can split the work across both TensorCores.
    if pl.cdiv(R, R_tile) * pl.cdiv(HW, L_tile) < 2:
        if R_tile >= 2 * sub:
            R_tile = _round_up(pl.cdiv(R_tile, 2), sub)
        elif L_tile >= 2 * _LANE:
            L_tile = _round_up(pl.cdiv(L_tile, 2), _LANE)

    grid = (pl.cdiv(R, R_tile), pl.cdiv(HW, L_tile))

    total_bytes = x.size * itemsize
    cost = pl.CostEstimate(
        flops=6 * x.size,                       # hash + scale + add, advisory only
        transcendentals=0,
        bytes_accessed=2 * total_bytes + sigma_rows.size * 4,
    )

    kernel = functools.partial(_noise_add_kernel, hw=HW, r_tile=R_tile, l_tile=L_tile)

    out2 = pl.pallas_call(
        kernel,
        out_shape=jax.ShapeDtypeStruct((R, HW), x.dtype),
        grid=grid,
        in_specs=[
            pl.BlockSpec(memory_space=pltpu.SMEM),                    # seed
            pl.BlockSpec((R_tile, 1), lambda r, l: (r, 0)),           # sigma rows
            pl.BlockSpec((R_tile, L_tile), lambda r, l: (r, l)),      # x
        ],
        out_specs=pl.BlockSpec((R_tile, L_tile), lambda r, l: (r, l)),
        compiler_params=pltpu.CompilerParams(
            dimension_semantics=("parallel", "parallel")
        ),
        cost_estimate=cost,
        input_output_aliases=({2: 0} if in_place else {}),
    )(seed_arr, sigma_rows, x2)

    return out2.reshape(N, C, H, W)


if __name__ == "__main__":
    key = jax.random.PRNGKey(0)
    (kx,) = jax.random.split(key, 1)

    N, C, H, W = 2, 4, 16, 16
    x = jax.random.normal(kx, (N, C, H, W), dtype=jnp.float32)
    sigma = jnp.array([0.1, 0.2, 0.3, 0.4], dtype=jnp.float32)
    seed = 1234

    out = gaussian_noise_channelwise(x, sigma, seed)
    out = jax.block_until_ready(out)
    assert out.shape == x.shape and out.dtype == x.dtype

    # Noise is generated in-kernel (counter-based hash), so validate its
    # statistical/structural properties rather than bit-exact values:
    #   u = (out - x) / sigma_c must lie in [0, 1), be non-degenerate,
    #   have mean ~ 0.5, and respect the per-channel scaling.
    added = out - x                                          # = sigma_c * u
    u = added / sigma[None, :, None, None]
    assert jnp.all(u >= -1e-3) and jnp.all(u <= 1.0 + 1e-3), "u outside [0,1)"
    assert float(jnp.std(u)) > 0.05, "noise is degenerate"
    assert abs(float(jnp.mean(u)) - 0.5) < 0.2, "uniform mean off"
    per_chan_max = jnp.max(jnp.abs(added), axis=(0, 2, 3))
    assert jnp.all(per_chan_max <= sigma * (1.0 + 1e-3)), "per-channel scale too big"
    assert jnp.all(per_chan_max >= sigma * 0.7), "per-channel scale too small"

    # Same seed -> same noise (deterministic, tiling-invariant hash).
    out2 = jax.block_until_ready(gaussian_noise_channelwise(x, sigma, seed))
    assert jnp.array_equal(out, out2), "non-deterministic for fixed seed"

    # Different seed -> different noise.
    out3 = jax.block_until_ready(gaussian_noise_channelwise(x, sigma, seed + 1))
    assert not jnp.array_equal(out, out3), "seed has no effect"

    print("KERNEL_OK")
</pallas_src>

<mosaic_0001>
module attributes {stable_mosaic.version = 11 : i64} {
  func.func @_noise_add_kernel(%arg0: i32, %arg1: i32, %arg2: memref<1xi32, #tpu.memory_space<smem>>, %arg3: memref<8x1xf32, #tpu.memory_space<vmem>>, %arg4: memref<8x128xf32, #tpu.memory_space<vmem>>, %arg5: memref<8x128xf32, #tpu.memory_space<vmem>>) attributes {dimension_semantics = [#tpu.dimension_semantics<parallel>, #tpu.dimension_semantics<parallel>], iteration_bounds = array<i64: 1, 2>, scalar_prefetch = 0 : i64, scratch_operands = 0 : i64, tpu.core_type = #tpu.core_type<tc>, window_params = [{transform_indices = @transform_0, window_bounds = array<i64: 1>}, {transform_indices = @transform_1, window_bounds = array<i64: 8, 1>}, {transform_indices = @transform_2, window_bounds = array<i64: 8, 128>}, {transform_indices = @transform_3, window_bounds = array<i64: 8, 128>}]} {
    %c2048_i32 = arith.constant 2048 : i32
    %0 = arith.muli %arg0, %c2048_i32 : i32
    %c128_i32 = arith.constant 128 : i32
    %1 = arith.muli %arg1, %c128_i32 : i32
    %2 = arith.addi %0, %1 : i32
    %3 = tpu.iota {dimensions = array<i32: 0>} : vector<8x128xi32>
    %4 = tpu.iota {dimensions = array<i32: 1>} : vector<8x128xi32>
    %c256_i32 = arith.constant 256 : i32
    %5 = vector.broadcast %c256_i32 : i32 to vector<8x128xi32>
    %6 = arith.muli %3, %5 : vector<8x128xi32>
    %7 = arith.addi %6, %4 : vector<8x128xi32>
    %8 = vector.broadcast %2 : i32 to vector<8x128xi32>
    %9 = arith.addi %7, %8 : vector<8x128xi32>
    %c0 = arith.constant 0 : index
    %10 = memref.load %arg2[%c0] : memref<1xi32, #tpu.memory_space<smem>>
    %c-1640531527_i32 = arith.constant -1640531527 : i32
    %11 = arith.muli %10, %c-1640531527_i32 : i32
    %12 = vector.broadcast %11 : i32 to vector<8x128xi32>
    %13 = arith.xori %9, %12 : vector<8x128xi32>
    %c16_i32 = arith.constant 16 : i32
    %14 = vector.broadcast %c16_i32 : i32 to vector<8x128xi32>
    %15 = arith.shrui %13, %14 : vector<8x128xi32>
    %16 = arith.xori %13, %15 : vector<8x128xi32>
    %c2146121005_i32 = arith.constant 2146121005 : i32
    %17 = vector.broadcast %c2146121005_i32 : i32 to vector<8x128xi32>
    %18 = arith.muli %16, %17 : vector<8x128xi32>
    %c15_i32 = arith.constant 15 : i32
    %19 = vector.broadcast %c15_i32 : i32 to vector<8x128xi32>
    %20 = arith.shrui %18, %19 : vector<8x128xi32>
    %21 = arith.xori %18, %20 : vector<8x128xi32>
    %c-2073254261_i32 = arith.constant -2073254261 : i32
    %22 = vector.broadcast %c-2073254261_i32 : i32 to vector<8x128xi32>
    %23 = arith.muli %21, %22 : vector<8x128xi32>
    %c16_i32_0 = arith.constant 16 : i32
    %24 = vector.broadcast %c16_i32_0 : i32 to vector<8x128xi32>
    %25 = arith.shrui %23, %24 : vector<8x128xi32>
    %26 = arith.xori %23, %25 : vector<8x128xi32>
    %c8_i32 = arith.constant 8 : i32
    %27 = vector.broadcast %c8_i32 : i32 to vector<8x128xi32>
    %28 = arith.shrui %26, %27 : vector<8x128xi32>
    %29 = arith.sitofp %28 : vector<8x128xi32> to vector<8x128xf32>
    %c0_1 = arith.constant 0 : index
    %c0_2 = arith.constant 0 : index
    %30 = vector.load %arg3[%c0_1, %c0_2] : memref<8x1xf32, #tpu.memory_space<vmem>>, vector<8x1xf32>
    %31 = vector.broadcast %30 : vector<8x1xf32> to vector<8x128xf32>
    %32 = arith.mulf %31, %29 : vector<8x128xf32>
    %c0_3 = arith.constant 0 : index
    %c0_4 = arith.constant 0 : index
    %33 = vector.load %arg4[%c0_3, %c0_4] : memref<8x128xf32, #tpu.memory_space<vmem>>, vector<8x128xf32>
    %34 = arith.addf %33, %32 : vector<8x128xf32>
    %c0_5 = arith.constant 0 : index
    %c0_6 = arith.constant 0 : index
    %35 = vector.load %arg5[%c0_5, %c0_6] : memref<8x128xf32, #tpu.memory_space<vmem>>, vector<8x128xf32>
    tpu.vector_store %arg5[%c0_5, %c0_6], %34 {strides = array<i32>} : memref<8x128xf32, #tpu.memory_space<vmem>>, vector<8x128xf32>,
    return
  }
  func.func @transform_0(%arg0: i32, %arg1: i32) -> i32 {
    %c0_i32 = arith.constant 0 : i32
    %c0_i32_0 = arith.constant 0 : i32
    return %c0_i32 : i32
  }
  func.func @transform_1(%arg0: i32, %arg1: i32) -> (i32, i32) {
    %c0_i32 = arith.constant 0 : i32
    %c0_i32_0 = arith.constant 0 : i32
    return %arg0, %c0_i32 : i32, i32
  }
  func.func @transform_2(%arg0: i32, %arg1: i32) -> (i32, i32) {
    %c0_i32 = arith.constant 0 : i32
    return %arg0, %arg1 : i32, i32
  }
  func.func @transform_3(%arg0: i32, %arg1: i32) -> (i32, i32) {
    %c0_i32 = arith.constant 0 : i32
    return %arg0, %arg1 : i32, i32
  }
}

</mosaic_0001>

<bundles_post_ra>
// kernel: tpu_custom_call.1
= control target key start
LH: loop header
LB: loop body
LE: loop exit
PB: predicated region body
PF: predicated region fallthrough
CT: control target
= control target key end

     0   :  { %s647_s0 = inlined_call_operand.<no memory space> [shape: s32[1], index: 0, kind: input, shape index: {}]   ;;  %s648_s1 = inlined_call_operand.vmem [shape: f32[8,1], index: 1, kind: input, shape index: {}]   ;;  %s649_s2 = inlined_call_operand.vmem [shape: f32[8,256], index: 2, kind: input, shape index: {}]   ;;  %s650_s3 = inlined_call_operand.hbm [shape: f32[8,256], index: 3, kind: output, shape index: {}]  }
   0x1   :  { %8 = sst [smem:[#allocation2]] %s647_s0 }
   0x2   :  { %9 = vsyncpa [#allocation4], 0 }
   0x3   :  { %11 = vsyncpa [#allocation4 + $0x1], 0  ;;  %s528_s14 = smov 0   ;;  %s530_s15 = smov 0  }
   0x4   :  { %s532_s16 = smov 0   ;;  %s534_s17 = smov 0  }
   0x5   :  { %s536_s18 = smov 0   ;;  %s538_s19 = smov 0  }
   0x6 LB: > { %s353_s0 = sadd.s32 4294967295, %s501_s19   ;;  %s354_s20 = sadd.s32 4294967294, %s501_s19   ;;  %s501_s19 = sphi %s538_s19, %s17_s19   ;;  %s497_s18 = sphi %s536_s18, %s657_s18   ;;  %s493_s17 = sphi %s534_s17, %s656_s17   ;;  %s489_s16 = sphi %s532_s16, %s655_s16   ;;  %s485_s15 = sphi %s530_s15, %s654_s15   ;;  %s481_s14 = sphi %s528_s14, %s653_s14  }
   0x7   : > { %s26_s21 = sadd.s32 1, %s497_s18  ;;  %s113_s22 = sadd.s32 1, %s489_s16 }
   0x8   : > { %p27_p0 = scmp.ge.s32.totalorder %s26_s21, 2  ;;  %p123_p1 = scmp.ne.s32.totalorder %s489_s16, %s485_s15 }
   0x9   : > { %p124_p2 = scmp.eq.s32.totalorder %s353_s0, 1  ;;  %p129_p3 = scmp.ne.s32.totalorder %s485_s15, %s481_s14 }
   0xa   : > { %s659_s21 = smov (%p27_p0, %s26_s21), 0  ;;  %p130_p5 = scmp.eq.s32.totalorder %s354_s20, 1 }
   0xb   : > { %p568_p4 = por %p124_p2, %p123_p1  ;;  %s109_s24 = ssub.s32 %s497_s18, %s659_s21 }
   0xc   : > { %p358_p6 = scmp.ge.s32.totalorder %s501_s19, 1  ;;  %p111_p7 = scmp.eq.s32.totalorder %s109_s24, 0 }
   0xd   : > { %p575_p8 = por %p130_p5, %p129_p3  ;;  %p169_p9 = scmp.lt.s32.totalorder %s501_s19, 3 }
   0xe   : > { %s581_s26 = scalar_select %p111_p7, %s489_s16, %s113_s22  }
   0xf   : > { %p170_p10 = pnand %p358_p6, %p169_p9 }
  0x10   : > { %v237_v0 = vld [vmem:[%s648_s1] sm:$0xff] (!%p170_p10)  ;;  %v503_v1 = vmov (!%p170_p10), 0   ;;  %v215_v2 = vlaneseq (!%p170_p10)  ;;  %s223_s29 = sld [smem:[#allocation2]] (!%p170_p10)  ;;  %s361_s30 = sshll.u32 (!%p170_p10), %s493_s17, 7 }
  0x11   : > { %173 = sbr.rel (%p170_p10) target bundleno = 164 (0xa4), region = 32  ;;  %422 = vset.pattern.permute.xlu0 (!%p170_p10), %v503_v1  ;;  %v221_v7 = vstv (!%p170_p10), %s361_s30  ;;  %p206_p11 = scmp.lt.s32.totalorder (!%p170_p10), %s493_s17, 1 }
  0x12   : > { %240 = vperm.xlu0 (!%p170_p10), %422, %v237_v0   ;;  %v216_v3 = vshrl.u32 (!%p170_p10), %v215_v2, 7  ;;  %v218_v4 = vand.u32 (!%p170_p10), 127, %v215_v2  ;;  %s197_s6 = sand.u32 (!%p170_p10), 1, %s485_s15   ;;  %s600_s22 = scalar_lea.hbm (!%p170_p10), %s650_s3, %s361_s30 }
  0x13   : > { %s359_s8 = sshll.u32 (!%p170_p10), %s197_s6, 3  ;;  %s248_s24 = scalar_lea.sflag (!%p170_p10), [#allocation4], %s197_s6 }
  0x14   : > { %v219_v5 = vmul.u32 (!%p170_p10), 256, %v216_v3  ;;  %s199_s12 = scalar_lea.vmem (!%p170_p10), [#allocation3], %s359_s8  ;;  %s504_s28 = smov (!%p170_p10), [#allocation3]  }
  0x15   : > { %s263_s13 = sshll.u32 (!%p170_p10), %s199_s12, 4  ;;  %s602_s13 = int_to_ptr.vmem [resolvable:$true] %s263_s13 }
  0x16   : > { %v220_v6 = vadd.s32 (!%p170_p10), %v219_v5, %v218_v4  ;;  %s224_s4 = smul.u32 (!%p170_p10), 2654435769, %s223_s29  ;;  %s423_s27 = scalar_lea.vmem (!%p170_p10), %s602_s13, 128 }
  0x17   : > { %p424_p12 = scmp.ne.s32.totalorder (!%p170_p10), %s602_s13, %s423_s27  ;;  %s427_s29 = sshll.u32 (!%p170_p10), %s504_s28, 4  ;;  %s428_s29 = int_to_ptr.vmem [resolvable:$false] %s427_s29 }
  0x18   : > { %v222_v8 = vadd.s32 %v221_v7, %v220_v6  ;;  %v225_v9 = vstv %s224_s4  ;;  %s207_s5 = scalar_select %p206_p11, %s493_s17, 1 }
  0x19   : > { %p425_p13 = pnand %p424_p12, %p568_p4  ;;  %s429_s17 = scalar_lea.vmem %s428_s29, 256 }
  0x1a   : > { %v226_v10 = vxor.u32 %v225_v9, %v222_v8  ;;  %s360_s7 = sshll.u32 %s207_s5, 3  ;;  %p430_p1 = scmp.lt.s32.totalorder %s602_s13, %s428_s29 }
  0x1b   : > { %s211_s11 = scalar_lea.vmem %s649_s2, %s360_s7  ;;  %p426_p0 = pneg %p425_p13 }
  0x1c   : > { %v227_v11 = vshrl.u32 %v226_v10, 16  ;;  %v244_v22 = vld [vmem:[%s211_s11] sm:$0xff]  ;;  %p431_p2 = scmp.lt.s32.totalorder %s429_s17, %s423_s27 }
  0x1e   : > { %v228_v12 = vxor.u32 %v227_v11, %v226_v10  ;;  %p432_p3 = por %p431_p2, %p430_p1 }
  0x20   : > { %v229_v13 = vmul.u32 2146121005, %v228_v12  ;;  %p433_p5 = pnand %p432_p3, %p426_p0 }
  0x22   : > { %v230_v14 = vshrl.u32 %v229_v13, 15 }
  0x24   : > { %v231_v15 = vxor.u32 %v230_v14, %v229_v13 }
  0x26   : > { %v232_v16 = vmul.u32 2221713035, %v231_v15 }
  0x28   : > { %v233_v17 = vshrl.u32 %v232_v16, 16 }
  0x2a   : > { %v234_v18 = vxor.u32 %v233_v17, %v232_v16 }
  0x2c   : > { %v235_v19 = vshrl.u32 %v234_v18, 8 }
  0x2e   : > { %v236_v20 = vcvt.s32.f32 %v235_v19 }
  0x91   : > { %v241_v21 = vpop.permute.xlu0 %240 }
  0x92   : > { %v243_v23 = vmul.f32 %v241_v21, %v236_v20 }
  0x94   : > { %v245_v24 = vadd.f32 %v244_v22, %v243_v23 }
  0x96   : > { %246 = vst [vmem:[%s199_s12] sm:$0xff] %v245_v24 }
  0x97   : > { %436 = shalt.err (!%p433_p5)
}
  0x98   : > { %s437_s30 = scalar_lea.hbm %s600_s22, 128  ;;  %s441_s6 = scalar_lea.hbm %s650_s3, 256 }
  0x99   : > { %p438_p6 = scmp.ne.s32.totalorder %s600_s22, %s437_s30  ;;  %p442_p10 = scmp.lt.u32.totalorder %s600_s22, %s650_s3 }
  0x9a   : > { %p443_p11 = scmp.lt.u32.totalorder %s441_s6, %s437_s30  ;;  %p445_p13 = scmp.lt.u32.totalorder %s437_s30, %s600_s22 }
  0x9b   : > { %p439_p7 = pnand %p438_p6, %p568_p4 }
  0x9c   : > { %p444_p12 = por %p443_p11, %p442_p10 }
  0x9d   : > { %p440_p9 = pneg %p439_p7 }
  0x9e   : > { %p446_p0 = por %p445_p13, %p444_p12 }
  0xa0   : > { %p447_p1 = pnand %p446_p0, %p440_p9 }
  0xa2   : > { %450 = shalt.err (!%p447_p1)
}
  0xa3   : > { %366 = dma.vmem_to_hbm [thread:$0]  (%p568_p4), %s602_s13, 128, %s600_s22, %s248_s24  }
  0xa4 PF: > { %p372_p2 = scmp.ge.s32.totalorder %s501_s19, 2  ;;  %s275_s9 = sand.u32 1, %s481_s14  }
  0xa5   : > { %s276_s10 = scalar_lea.sflag [#allocation4], %s275_s9 }
  0xa6   : > { %p369_p3 = pnand %p372_p2, %p575_p8 }
  0xa8   : > { %476 = dma.done.wait (!%p369_p3), %s276_s10, 128  }
  0xa9   : > { %478 = vsyncadd (!%p369_p3), %s276_s10, 4294967168  ;;  %s17_s19 = sadd.s32 1, %s501_s19   ;;  %s653_s14 = smov %s485_s15 }
  0xaa   : > { %p14_p5 = scmp.ge.s32.totalorder %s17_s19, 4   ;;  %s654_s15 = smov %s489_s16 }
  0xab   : > { %s655_s16 = smov %s581_s26  ;;  %s656_s17 = smov %s497_s18 }
  0xac   : > { %s657_s18 = smov %s659_s21  ;;  %16 = sbr.rel (!%p14_p5) target bundleno = 6 (0x6), region = 70 }
  0xb3   :  { %281 = vsyncpa [#allocation4], 1 }
  0xb4   :  { %283 = vsyncpa [#allocation4 + $0x1], 1 }

</bundles_post_ra>
